<compile_context>
chip_gen: v7x
topology: tpu7x:2x2x1
jax: 0.10.0
libtpu: 0.0.40
codegen_flags: <defaults>
</compile_context>

<pallas_src>
import functools

import jax
import jax.numpy as jnp
from jax.experimental import pallas as pl
from jax.experimental.pallas import tpu as pltpu

IN_F = 256
HID = 128
OUT_F = 10
OUT_PAD = 128  # lane-dense padded fc3 width (full 128-lane unmasked vst)


def mlp_kernel(x_ref, w1_ref, b1_ref, w2_ref, b2_ref, w3_ref, b3_ref, o_ref):
    # In-kernel downcast of the streamed f32 x tile (no separate XLA cast pass).
    x = x_ref[...].astype(jnp.bfloat16)
    # fc1 + relu : bf16 MXU operands, f32 accumulation, f32 bias/ReLU
    h1 = jnp.dot(x, w1_ref[...], preferred_element_type=jnp.float32)
    h1 = jnp.maximum(h1 + b1_ref[...], 0.0).astype(jnp.bfloat16)
    # fc2 + relu
    h2 = jnp.dot(h1, w2_ref[...], preferred_element_type=jnp.float32)
    h2 = jnp.maximum(h2 + b2_ref[...], 0.0).astype(jnp.bfloat16)
    # fc3 (padded to 128 lanes) -> bf16 lane-dense writeback (half the HBM bytes)
    out = jnp.dot(h2, w3_ref[...], preferred_element_type=jnp.float32) + b3_ref[...]
    o_ref[...] = out.astype(o_ref.dtype)


def prepare_params(w1, b1, w2, b2, w3, b3):
    """One-time param prep (hoisted out of the per-call wrapper)."""
    w3_pad = jnp.zeros((w3.shape[0], OUT_PAD), jnp.float32).at[:, :OUT_F].set(w3)
    b3_pad = jnp.zeros((OUT_PAD,), jnp.float32).at[:OUT_F].set(b3)
    return (
        w1.astype(jnp.bfloat16),
        b1.reshape(1, -1).astype(jnp.float32),
        w2.astype(jnp.bfloat16),
        b2.reshape(1, -1).astype(jnp.float32),
        w3_pad.astype(jnp.bfloat16),
        b3_pad.reshape(1, -1).astype(jnp.float32),
    )


def _round_up8(n):
    return ((n + 7) // 8) * 8


@functools.partial(jax.jit, static_argnames=("tm",))
def mlp_forward(x, w1, b1, w2, b2, w3p, b3p, *, tm=2048):
    B = x.shape[0]
    # Batch tile:
    #  - large default (2048 rows) so per-grid-step pipeline overhead is amortized
    #    and the kernel sits near the HBM roofline on all generations;
    #  - clamped to round8(ceil(B/2)) so mid-size batches still yield >=2 grid
    #    steps for the "parallel" batch axis (both v7x TensorCores get work);
    #  - at tm=2048: double-buffered f32 x tile (2*2 MiB) + bf16 out tile
    #    (2*0.5 MiB) + resident weights (~0.2 MiB) stay well under every
    #    scoped-VMEM default (v5e 16 MiB, v6e/v7x 32 MiB).
    TM = max(8, min(tm, _round_up8(pl.cdiv(B, 2))))
    grid_m = pl.cdiv(B, TM)
    # No jnp.pad of x for ragged B: Pallas masks the partial last block (OOB rows
    # are undefined on read and their output rows are discarded on writeback).

    # Weights/biases: same block every grid step -> VMEM-resident, no re-DMA.
    # (pipeline_mode=pl.Buffered(1) would shave ~0.3 MiB of second buffers; left
    #  at the default to keep the compile path maximally safe.)
    resident = lambda shape: pl.BlockSpec(shape, lambda i: (0, 0))

    out_pad = pl.pallas_call(
        mlp_kernel,
        out_shape=jax.ShapeDtypeStruct((B, OUT_PAD), jnp.bfloat16),
        grid=(grid_m,),
        in_specs=[
            pl.BlockSpec((TM, IN_F), lambda i: (i, 0)),  # f32 x streams over batch
            resident(w1.shape),
            resident(b1.shape),
            resident(w2.shape),
            resident(b2.shape),
            resident(w3p.shape),
            resident(b3p.shape),
        ],
        out_specs=pl.BlockSpec((TM, OUT_PAD), lambda i: (i, 0)),
        compiler_params=pltpu.CompilerParams(
            dimension_semantics=("parallel",),  # batch axis shards across TCs (v7x)
            vmem_limit_bytes=32 * 1024 * 1024,  # headroom for larger tm sweeps on v5e
        ),
    )(x, w1, b1, w2, b2, w3p, b3p)

    # Tiny (B,10) slice; cast back to f32 to match the torch module's f32 logits.
    return out_pad[:, :OUT_F].astype(jnp.float32)


def init_params(key):
    # Deterministic synthetic init (uniform, torch-default fan-in bound).
    # Weights stored transposed vs torch: (in_features, out_features).
    def linear(key, fan_in, fan_out):
        kw, kb = jax.random.split(key)
        bound = 1.0 / jnp.sqrt(fan_in)
        w = jax.random.uniform(kw, (fan_in, fan_out), jnp.float32, -bound, bound)
        b = jax.random.uniform(kb, (fan_out,), jnp.float32, -bound, bound)
        return w, b

    k1, k2, k3 = jax.random.split(key, 3)
    w1, b1 = linear(k1, IN_F, HID)
    w2, b2 = linear(k2, HID, HID)
    w3, b3 = linear(k3, HID, OUT_F)
    return w1, b1, w2, b2, w3, b3


def _reference_bf16(x, params):
    """Reference mirroring the kernel's dtype path (bf16 operands, f32 accum)."""
    w1, b1, w2, b2, w3p, b3p = params
    xb = x.astype(jnp.bfloat16)
    h = jnp.maximum(jnp.dot(xb, w1, preferred_element_type=jnp.float32) + b1, 0.0)
    h = jnp.maximum(
        jnp.dot(h.astype(jnp.bfloat16), w2, preferred_element_type=jnp.float32) + b2,
        0.0,
    )
    o = jnp.dot(h.astype(jnp.bfloat16), w3p, preferred_element_type=jnp.float32) + b3p
    return o[:, :OUT_F]


if __name__ == "__main__":
    key = jax.random.PRNGKey(0)
    k_params, k_x1, k_x2 = jax.random.split(key, 3)
    raw = init_params(k_params)
    params = prepare_params(*raw)  # hoisted: done once, reused every call

    # Case 1: small aligned batch.
    x = jax.random.normal(k_x1, (8, IN_F), jnp.float32)
    out = jax.block_until_ready(mlp_forward(x, *params))
    assert out.shape == (8, OUT_F)
    ref = _reference_bf16(x, params)
    assert jnp.allclose(out, ref, atol=3e-2, rtol=3e-2)

    # Case 2: ragged batch (exercises the partial last block — no jnp.pad of x).
    x2 = jax.random.normal(k_x2, (12, IN_F), jnp.float32)
    out2 = jax.block_until_ready(mlp_forward(x2, *params))
    assert out2.shape == (12, OUT_F)
    ref2 = _reference_bf16(x2, params)
    assert jnp.allclose(out2, ref2, atol=3e-2, rtol=3e-2)

    # Loose sanity check against the full-f32 module reference (bf16 cast error only).
    w1f, b1f, w2f, b2f, w3f, b3f = raw
    ref32 = jnp.maximum(x @ w1f + b1f, 0.0)
    ref32 = jnp.maximum(ref32 @ w2f + b2f, 0.0)
    ref32 = ref32 @ w3f + b3f
    assert jnp.allclose(out, ref32, atol=1.5e-1, rtol=1.5e-1)

    print("KERNEL_OK")
</pallas_src>

<mosaic_0001>
module attributes {stable_mosaic.version = 11 : i64} {
  func.func @mlp_kernel(%arg0: i32, %arg1: memref<8x256xf32, #tpu.memory_space<vmem>>, %arg2: memref<256x128xbf16, #tpu.memory_space<vmem>>, %arg3: memref<1x128xf32, #tpu.memory_space<vmem>>, %arg4: memref<128x128xbf16, #tpu.memory_space<vmem>>, %arg5: memref<1x128xf32, #tpu.memory_space<vmem>>, %arg6: memref<128x128xbf16, #tpu.memory_space<vmem>>, %arg7: memref<1x128xf32, #tpu.memory_space<vmem>>, %arg8: memref<8x128xbf16, #tpu.memory_space<vmem>>) attributes {dimension_semantics = [#tpu.dimension_semantics<parallel>], iteration_bounds = array<i64: 1>, scalar_prefetch = 0 : i64, scratch_operands = 0 : i64, tpu.core_type = #tpu.core_type<tc>, window_params = [{transform_indices = @transform_0, window_bounds = array<i64: 8, 256>}, {pipeline_mode = #tpu.pipeline_mode<synchronous>, transform_indices = @transform_1, window_bounds = array<i64: 256, 128>}, {pipeline_mode = #tpu.pipeline_mode<synchronous>, transform_indices = @transform_2, window_bounds = array<i64: 1, 128>}, {pipeline_mode = #tpu.pipeline_mode<synchronous>, transform_indices = @transform_3, window_bounds = array<i64: 128, 128>}, {pipeline_mode = #tpu.pipeline_mode<synchronous>, transform_indices = @transform_4, window_bounds = array<i64: 1, 128>}, {pipeline_mode = #tpu.pipeline_mode<synchronous>, transform_indices = @transform_5, window_bounds = array<i64: 128, 128>}, {pipeline_mode = #tpu.pipeline_mode<synchronous>, transform_indices = @transform_6, window_bounds = array<i64: 1, 128>}, {transform_indices = @transform_7, window_bounds = array<i64: 8, 128>}]} {
    %c0 = arith.constant 0 : index
    %c0_0 = arith.constant 0 : index
    %0 = vector.load %arg1[%c0, %c0_0] : memref<8x256xf32, #tpu.memory_space<vmem>>, vector<8x256xf32>
    %1 = arith.truncf %0 : vector<8x256xf32> to vector<8x256xbf16>
    %c0_1 = arith.constant 0 : index
    %c0_2 = arith.constant 0 : index
    %2 = vector.load %arg2[%c0_1, %c0_2] : memref<256x128xbf16, #tpu.memory_space<vmem>>, vector<256x128xbf16>
    %cst = arith.constant dense<0.000000e+00> : vector<8x128xf32>
    %3 = tpu.matmul %1, %2, %cst {dimension_numbers = #tpu.dot_dimension_numbers<[1], [0], [0], [1], [0, 0, 1, 1], [], []>} : vector<8x256xbf16>, vector<256x128xbf16>, vector<8x128xf32> -> vector<8x128xf32>
    %c0_3 = arith.constant 0 : index
    %c0_4 = arith.constant 0 : index
    %4 = vector.load %arg3[%c0_3, %c0_4] : memref<1x128xf32, #tpu.memory_space<vmem>>, vector<1x128xf32>
    %5 = vector.broadcast %4 : vector<1x128xf32> to vector<8x128xf32>
    %6 = arith.addf %3, %5 : vector<8x128xf32>
    %cst_5 = arith.constant 0.000000e+00 : f32
    %7 = vector.broadcast %cst_5 : f32 to vector<8x128xf32>
    %8 = arith.maximumf %6, %7 : vector<8x128xf32>
    %9 = arith.truncf %8 : vector<8x128xf32> to vector<8x128xbf16>
    %c0_6 = arith.constant 0 : index
    %c0_7 = arith.constant 0 : index
    %10 = vector.load %arg4[%c0_6, %c0_7] : memref<128x128xbf16, #tpu.memory_space<vmem>>, vector<128x128xbf16>
    %cst_8 = arith.constant dense<0.000000e+00> : vector<8x128xf32>
    %11 = tpu.matmul %9, %10, %cst_8 {dimension_numbers = #tpu.dot_dimension_numbers<[1], [0], [0], [1], [0, 0, 1, 1], [], []>} : vector<8x128xbf16>, vector<128x128xbf16>, vector<8x128xf32> -> vector<8x128xf32>
    %c0_9 = arith.constant 0 : index
    %c0_10 = arith.constant 0 : index
    %12 = vector.load %arg5[%c0_9, %c0_10] : memref<1x128xf32, #tpu.memory_space<vmem>>, vector<1x128xf32>
    %13 = vector.broadcast %12 : vector<1x128xf32> to vector<8x128xf32>
    %14 = arith.addf %11, %13 : vector<8x128xf32>
    %cst_11 = arith.constant 0.000000e+00 : f32
    %15 = vector.broadcast %cst_11 : f32 to vector<8x128xf32>
    %16 = arith.maximumf %14, %15 : vector<8x128xf32>
    %17 = arith.truncf %16 : vector<8x128xf32> to vector<8x128xbf16>
    %c0_12 = arith.constant 0 : index
    %c0_13 = arith.constant 0 : index
    %18 = vector.load %arg6[%c0_12, %c0_13] : memref<128x128xbf16, #tpu.memory_space<vmem>>, vector<128x128xbf16>
    %cst_14 = arith.constant dense<0.000000e+00> : vector<8x128xf32>
    %19 = tpu.matmul %17, %18, %cst_14 {dimension_numbers = #tpu.dot_dimension_numbers<[1], [0], [0], [1], [0, 0, 1, 1], [], []>} : vector<8x128xbf16>, vector<128x128xbf16>, vector<8x128xf32> -> vector<8x128xf32>
    %c0_15 = arith.constant 0 : index
    %c0_16 = arith.constant 0 : index
    %20 = vector.load %arg7[%c0_15, %c0_16] : memref<1x128xf32, #tpu.memory_space<vmem>>, vector<1x128xf32>
    %21 = vector.broadcast %20 : vector<1x128xf32> to vector<8x128xf32>
    %22 = arith.addf %19, %21 : vector<8x128xf32>
    %23 = arith.truncf %22 : vector<8x128xf32> to vector<8x128xbf16>
    %c0_17 = arith.constant 0 : index
    %c0_18 = arith.constant 0 : index
    %24 = vector.load %arg8[%c0_17, %c0_18] : memref<8x128xbf16, #tpu.memory_space<vmem>>, vector<8x128xbf16>
    tpu.vector_store %arg8[%c0_17, %c0_18], %23 {strides = array<i32>} : memref<8x128xbf16, #tpu.memory_space<vmem>>, vector<8x128xbf16>,
    return
  }
  func.func @transform_0(%arg0: i32) -> (i32, i32) {
    %c0_i32 = arith.constant 0 : i32
    %c0_i32_0 = arith.constant 0 : i32
    return %arg0, %c0_i32 : i32, i32
  }
  func.func @transform_1(%arg0: i32) -> (i32, i32) {
    %c0_i32 = arith.constant 0 : i32
    %c0_i32_0 = arith.constant 0 : i32
    %c0_i32_1 = arith.constant 0 : i32
    return %c0_i32, %c0_i32_0 : i32, i32
  }
  func.func @transform_2(%arg0: i32) -> (i32, i32) {
    %c0_i32 = arith.constant 0 : i32
    %c0_i32_0 = arith.constant 0 : i32
    %c0_i32_1 = arith.constant 0 : i32
    return %c0_i32, %c0_i32_0 : i32, i32
  }
  func.func @transform_3(%arg0: i32) -> (i32, i32) {
    %c0_i32 = arith.constant 0 : i32
    %c0_i32_0 = arith.constant 0 : i32
    %c0_i32_1 = arith.constant 0 : i32
    return %c0_i32, %c0_i32_0 : i32, i32
  }
  func.func @transform_4(%arg0: i32) -> (i32, i32) {
    %c0_i32 = arith.constant 0 : i32
    %c0_i32_0 = arith.constant 0 : i32
    %c0_i32_1 = arith.constant 0 : i32
    return %c0_i32, %c0_i32_0 : i32, i32
  }
  func.func @transform_5(%arg0: i32) -> (i32, i32) {
    %c0_i32 = arith.constant 0 : i32
    %c0_i32_0 = arith.constant 0 : i32
    %c0_i32_1 = arith.constant 0 : i32
    return %c0_i32, %c0_i32_0 : i32, i32
  }
  func.func @transform_6(%arg0: i32) -> (i32, i32) {
    %c0_i32 = arith.constant 0 : i32
    %c0_i32_0 = arith.constant 0 : i32
    %c0_i32_1 = arith.constant 0 : i32
    return %c0_i32, %c0_i32_0 : i32, i32
  }
  func.func @transform_7(%arg0: i32) -> (i32, i32) {
    %c0_i32 = arith.constant 0 : i32
    %c0_i32_0 = arith.constant 0 : i32
    return %arg0, %c0_i32 : i32, i32
  }
}

</mosaic_0001>

<bundles_post_ra>
// kernel: mlp_forward.1
= control target key start
LH: loop header
LB: loop body
LE: loop exit
PB: predicated region body
PF: predicated region fallthrough
CT: control target
= control target key end

     0   :  { %12 = vsyncpa [#allocation3], 0  ;;  %s878_s0 = inlined_call_operand.hbm [shape: f32[8,256], index: 0, kind: input, shape index: {}]   ;;  %s879_s1 = inlined_call_operand.hbm [shape: bf16[256,128], index: 1, kind: input, shape index: {}]   ;;  %s880_s2 = inlined_call_operand.vmem [shape: f32[1,128], index: 2, kind: input, shape index: {}]   ;;  %s881_s3 = inlined_call_operand.hbm [shape: bf16[128,128], index: 3, kind: input, shape index: {}]   ;;  %s882_s4 = inlined_call_operand.vmem [shape: f32[1,128], index: 4, kind: input, shape index: {}]   ;;  %s883_s5 = inlined_call_operand.hbm [shape: bf16[128,128], index: 5, kind: input, shape index: {}]   ;;  %s884_s6 = inlined_call_operand.vmem [shape: f32[1,128], index: 6, kind: input, shape index: {}]   ;;  %s885_s7 = inlined_call_operand.vmem [shape: bf16[8,128], index: 7, kind: output, shape index: {}]  }
   0x1   :  { %13 = vsyncpa [#allocation5], 0 }
   0x2   :  { %14 = vsyncpa [#allocation8], 0  ;;  %s743_s24 = smov [#allocation4]   ;;  %s649_s28 = scalar_lea.hbm %s879_s1, 2048 }
   0x3   :  { %s30_s25 = sshll.u32 %s743_s24, 4  ;;  %p650_p0 = scmp.ne.s32.totalorder %s879_s1, %s649_s28  ;;  %s31_s25 = int_to_ptr.vmem [resolvable:$true] %s30_s25 }
   0x4   :  { %p653_p1 = scmp.lt.u32.totalorder %s649_s28, %s879_s1 }
   0x6   :  { %p655_p2 = pnand %p653_p1, %p650_p0 }
   0x8   :  { %658 = shalt.err (!%p655_p2)
}
   0x9   :  { %s659_s10 = scalar_lea.vmem %s31_s25, 2048  ;;  %p664_p4 = scmp.lt.s32.totalorder %s31_s25, %s31_s25 }
   0xa   :  { %p660_p3 = scmp.ne.s32.totalorder %s31_s25, %s659_s10  ;;  %p665_p5 = scmp.lt.s32.totalorder %s659_s10, %s659_s10 }
   0xc   :  { %p666_p6 = por %p665_p5, %p664_p4 }
   0xe   :  { %p667_p7 = pnand %p666_p6, %p660_p3 }
  0x10   :  { %670 = shalt.err (!%p667_p7)
}
  0x11   :  { %s744_s11 = smov 64   ;;  %s745_s12 = smov 4  }
  0x12   :  { %36 = dma.hbm_to_vmem [thread:$0]  %s879_s1, 2048, %s31_s25, [#allocation5], %s744_s11, %s744_s11, %s745_s12  }
  0x13   :  { %s746_s15 = smov [#allocation2]   ;;  %s747_s17 = smov [#allocation6]  }
  0x14   :  { %s21_s16 = sshll.u32 %s746_s15, 4  ;;  %s44_s18 = sshll.u32 %s747_s17, 4  ;;  %s22_s16 = int_to_ptr.vmem [resolvable:$true] %s21_s16  ;;  %s45_s18 = int_to_ptr.vmem [resolvable:$true] %s44_s18 }
  0x15   :  { %s671_s21 = scalar_lea.hbm %s878_s0, 256 }
  0x16   :  { %p672_p8 = scmp.ne.s32.totalorder %s878_s0, %s671_s21  ;;  %p675_p9 = scmp.lt.u32.totalorder %s671_s21, %s878_s0 }
  0x18   :  { %p677_p10 = pnand %p675_p9, %p672_p8 }
  0x1a   :  { %680 = shalt.err (!%p677_p10)
}
  0x1b   :  { %s681_s1 = scalar_lea.vmem %s22_s16, 256  ;;  %p686_p12 = scmp.lt.s32.totalorder %s22_s16, %s22_s16 }
  0x1c   :  { %p682_p11 = scmp.ne.s32.totalorder %s22_s16, %s681_s1  ;;  %p687_p13 = scmp.lt.s32.totalorder %s681_s1, %s681_s1 }
  0x1e   :  { %p688_p0 = por %p687_p13, %p686_p12 }
  0x20   :  { %p689_p1 = pnand %p688_p0, %p682_p11 }
  0x22   :  { %692 = shalt.err (!%p689_p1)
}
  0x23   :  { %24 = dma.hbm_to_vmem [thread:$0]  %s878_s0, 256, %s22_s16, [#allocation3]  }
  0x24   :  { %s693_s30 = scalar_lea.hbm %s881_s3, 1024 }
  0x25   :  { %p694_p2 = scmp.ne.s32.totalorder %s881_s3, %s693_s30  ;;  %p697_p3 = scmp.lt.u32.totalorder %s693_s30, %s881_s3 }
  0x27   :  { %p699_p4 = pnand %p697_p3, %p694_p2 }
  0x29   :  { %702 = shalt.err (!%p699_p4)
}
  0x2a   :  { %s703_s14 = scalar_lea.vmem %s45_s18, 1024  ;;  %p708_p6 = scmp.lt.s32.totalorder %s45_s18, %s45_s18 }
  0x2b   :  { %p704_p5 = scmp.ne.s32.totalorder %s45_s18, %s703_s14  ;;  %p709_p7 = scmp.lt.s32.totalorder %s703_s14, %s703_s14 }
  0x2d   :  { %p710_p8 = por %p709_p7, %p708_p6 }
  0x2f   :  { %p711_p9 = pnand %p710_p8, %p704_p5 }
  0x31   :  { %714 = shalt.err (!%p711_p9)
}
  0x32   :  { %50 = dma.hbm_to_vmem [thread:$0]  %s881_s3, 1024, %s45_s18, [#allocation5], %s744_s11, %s744_s11, %s745_s12  }
  0x33   :  { %s748_s16 = smov [#allocation7]   ;;  %s715_s21 = scalar_lea.hbm %s883_s5, 1024 }
  0x34   :  { %s58_s17 = sshll.u32 %s748_s16, 4  ;;  %p716_p10 = scmp.ne.s32.totalorder %s883_s5, %s715_s21  ;;  %s59_s17 = int_to_ptr.vmem [resolvable:$true] %s58_s17 }
  0x35   :  { %p719_p11 = scmp.lt.u32.totalorder %s715_s21, %s883_s5 }
  0x37   :  { %p721_p12 = pnand %p719_p11, %p716_p10 }
  0x39   :  { %724 = shalt.err (!%p721_p12)
}
  0x3a   :  { %s725_s1 = scalar_lea.vmem %s59_s17, 1024  ;;  %p730_p0 = scmp.lt.s32.totalorder %s59_s17, %s59_s17 }
  0x3b   :  { %p726_p13 = scmp.ne.s32.totalorder %s59_s17, %s725_s1  ;;  %p731_p1 = scmp.lt.s32.totalorder %s725_s1, %s725_s1 }
  0x3d   :  { %p732_p2 = por %p731_p1, %p730_p0 }
  0x3f   :  { %p733_p3 = pnand %p732_p2, %p726_p13 }
  0x41   :  { %736 = shalt.err (!%p733_p3)
}
  0x42   :  { %64 = dma.hbm_to_vmem [thread:$0]  %s883_s5, 1024, %s59_s17, [#allocation8], %s744_s11, %s744_s11, %s745_s12  }
  0x43   :  { %737 = dma.done.wait [#allocation3], 256  }
  0x44   :  { %738 = vsyncadd [#allocation3], 4294967040 }
  0x45   :  { %739 = dma.done.wait [#allocation5], 3072  }
  0x46   :  { %740 = vsyncadd [#allocation5], 4294964224 }
  0x47   :  { %741 = dma.done.wait [#allocation8], 1024  }
  0x48   :  { %742 = vsyncadd [#allocation8], 4294966272  ;;  %v749_v0 = vmov 0.0   ;;  %v617_v1 = vld [vmem:[#allocation4 + $0x40] sm:$0xff]   ;;  %v619_v3 = vld [vmem:[#allocation4 + $0x48] sm:$0xff]   ;;  %vm750_vm0 = vmmov 0  }
  0x49   :  { %569 = vmatprep.subr.bf16.mxu1 %v749_v0  ;;  %v618_v2 = vld [vmem:[#allocation4] sm:$0xff]   ;;  %529 = vmatprep.subr.bf16.mxu0 %v617_v1  ;;  %v620_v4 = vld [vmem:[#allocation4 + $0x8] sm:$0xff]   ;;  %v621_v5 = vld [vmem:[#allocation4 + $0x50] sm:$0xff]  }
  0x4a   :  { %530 = vmatpush3.bf16.msra.mxu0 %v618_v2  ;;  %v622_v6 = vld [vmem:[#allocation4 + $0x10] sm:$0xff]   ;;  %v623_v7 = vld [vmem:[#allocation4 + $0x58] sm:$0xff]   ;;  %v625_v9 = vld [vmem:[#allocation4 + $0x60] sm:$0xff]   ;;  %585 = vmatprep.mubr.msk.bf16.mxu1 %vm750_vm0, %v749_v0 }
  0x4b   :  { %531 = vmatprep.subr.bf16.mxu0 %v619_v3  ;;  %v624_v8 = vld [vmem:[#allocation4 + $0x18] sm:$0xff]   ;;  %v626_v10 = vld [vmem:[#allocation4 + $0x20] sm:$0xff]   ;;  %v627_v11 = vld [vmem:[#allocation4 + $0x68] sm:$0xff]  }
  0x4c   :  { %v81_v12 = vld [vmem:[#allocation2 + $0x8] sm:$0xff]  ;;  %v633_v14 = vld [vmem:[#allocation6] sm:$0xff]   ;;  %v628_v15 = vld [vmem:[#allocation4 + $0x28] sm:$0xff]  }
  0x4d   :  { %v83_v13 = vpack.c.bf16 %v81_v12, %v81_v12  ;;  %v629_v16 = vld [vmem:[#allocation4 + $0x70] sm:$0xff]   ;;  %570 = vmatpush3.bf16.msra.mxu1 %v633_v14  ;;  %v634_v17 = vld [vmem:[#allocation6 + $0x8] sm:$0xff]   ;;  %v631_v19 = vld [vmem:[#allocation4 + $0x78] sm:$0xff]  }
  0x4e   :  { %532 = vmatpush3.bf16.msra.mxu0 %v620_v4  ;;  %v630_v18 = vld [vmem:[#allocation4 + $0x30] sm:$0xff]   ;;  %571 = vmatprep.subr.bf16.mxu1 %v749_v0  ;;  %v632_v21 = vld [vmem:[#allocation4 + $0x38] sm:$0xff]   ;;  %v637_v25 = vld [vmem:[#allocation6 + $0x20] sm:$0xff]  }
  0x4f   :  { %533 = vmatprep.subr.bf16.mxu0 %v621_v5  ;;  %251 = vmatprep.mubr.bf16.mxu0 %v83_v13  ;;  %v635_v20 = vld [vmem:[#allocation6 + $0x10] sm:$0xff]   ;;  %v636_v23 = vld [vmem:[#allocation6 + $0x18] sm:$0xff]   ;;  %v638_v26 = vld [vmem:[#allocation6 + $0x28] sm:$0xff]  }
  0x50   :  { %v80_v22 = vld [vmem:[#allocation2] sm:$0xff]  ;;  %v640_v28 = vld [vmem:[#allocation6 + $0x38] sm:$0xff]   ;;  %v641_v29 = vld [vmem:[#allocation7] sm:$0xff]  }
  0x51   :  { %572 = vmatpush3.bf16.msra.mxu1 %v634_v17  ;;  %v82_v24 = vpack.c.bf16 %v80_v22, %v80_v22  ;;  %v639_v27 = vld [vmem:[#allocation6 + $0x30] sm:$0xff]   ;;  %v642_v30 = vld [vmem:[#allocation7 + $0x8] sm:$0xff]   ;;  %v644_v32 = vld [vmem:[#allocation7 + $0x18] sm:$0xff]  }
  0x52   :  { %534 = vmatpush3.bf16.msra.mxu0 %v622_v6  ;;  %573 = vmatprep.subr.bf16.mxu1 %v749_v0  ;;  %v643_v31 = vld [vmem:[#allocation7 + $0x10] sm:$0xff]   ;;  %v645_v33 = vld [vmem:[#allocation7 + $0x20] sm:$0xff]   ;;  %v646_v34 = vld [vmem:[#allocation7 + $0x28] sm:$0xff]  }
  0x53   :  { %535 = vmatprep.subr.bf16.mxu0 %v623_v7  ;;  %v494_v36 = vld [vmem:[%s880_s2] ss:$0 sm:$0xff]  ;;  %v648_v45 = vld [vmem:[#allocation7 + $0x38] sm:$0xff]  }
  0x54   :  { %v647_v44 = vld [vmem:[#allocation7 + $0x30] sm:$0xff]  }
  0x55   :  { %574 = vmatpush3.bf16.msra.mxu1 %v635_v20  ;;  %v511_v46 = vld [vmem:[%s882_s4] ss:$0 sm:$0xff] }
  0x56   :  { %536 = vmatpush3.bf16.msra.mxu0 %v624_v8  ;;  %575 = vmatprep.subr.bf16.mxu1 %v749_v0  ;;  %v520_v54 = vld [vmem:[%s884_s6] ss:$0 sm:$0xff] }
  0x57   :  { %537 = vmatprep.subr.bf16.mxu0 %v625_v9 }
  0x59   :  { %576 = vmatpush3.bf16.msra.mxu1 %v636_v23 }
  0x5a   :  { %538 = vmatpush3.bf16.msra.mxu0 %v626_v10  ;;  %577 = vmatprep.subr.bf16.mxu1 %v749_v0 }
  0x5b   :  { %539 = vmatprep.subr.bf16.mxu0 %v627_v11 }
  0x5d   :  { %578 = vmatpush3.bf16.msra.mxu1 %v637_v25 }
  0x5e   :  { %540 = vmatpush3.bf16.msra.mxu0 %v628_v15  ;;  %579 = vmatprep.subr.bf16.mxu1 %v749_v0 }
  0x5f   :  { %541 = vmatprep.subr.bf16.mxu0 %v629_v16 }
  0x61   :  { %580 = vmatpush3.bf16.msra.mxu1 %v638_v26 }
  0x62   :  { %542 = vmatpush3.bf16.msra.mxu0 %v630_v18  ;;  %581 = vmatprep.subr.bf16.mxu1 %v749_v0 }
  0x63   :  { %543 = vmatprep.subr.bf16.mxu0 %v631_v19 }
  0x65   :  { %582 = vmatpush3.bf16.msra.mxu1 %v639_v27 }
  0x66   :  { %544 = vmatpush3.bf16.msra.mxu0 %v632_v21  ;;  %583 = vmatprep.subr.bf16.mxu1 %v749_v0 }
  0x67   :  { %589 = vmatprep.subr.bf16.mxu0 %v749_v0 }
  0x69   :  { %252 = vmatmul.mubr.bf16.vlgmr.msra.gmra.mrb[0].mxu0 %v82_v24  ;;  %584 = vmatpush3.bf16.msra.mxu1 %v640_v28 }
  0x6a   :  { %605 = vmatprep.mubr.msk.bf16.mxu0 %vm750_vm0, %v749_v0  ;;  %590 = vmatpush3.bf16.msra.mxu0 %v641_v29 }
  0x6b   :  { %591 = vmatprep.subr.bf16.mxu0 %v749_v0 }
  0x6e   :  { %592 = vmatpush3.bf16.msra.mxu0 %v642_v30 }
  0x6f   :  { %593 = vmatprep.subr.bf16.mxu0 %v749_v0 }
  0x72   :  { %594 = vmatpush3.bf16.msra.mxu0 %v643_v31 }
  0x73   :  { %595 = vmatprep.subr.bf16.mxu0 %v749_v0 }
  0x76   :  { %596 = vmatpush3.bf16.msra.mxu0 %v644_v32 }
  0x77   :  { %597 = vmatprep.subr.bf16.mxu0 %v749_v0 }
  0x7a   :  { %598 = vmatpush3.bf16.msra.mxu0 %v645_v33 }
  0x7b   :  { %599 = vmatprep.subr.bf16.mxu0 %v749_v0 }
  0x7e   :  { %600 = vmatpush3.bf16.msra.mxu0 %v646_v34 }
  0x7f   :  { %601 = vmatprep.subr.bf16.mxu0 %v749_v0 }
  0x82   :  { %602 = vmatpush3.bf16.msra.mxu0 %v647_v44 }
  0x83   :  { %603 = vmatprep.subr.bf16.mxu0 %v749_v0 }
  0x86   :  { %604 = vmatpush3.bf16.msra.mxu0 %v648_v45 }
 0x13c   :  { %v545_v35 = vpop.f32.mrb[0].mxu0 }
 0x13d   :  { %v546_v37 = vpop.f32.mrb[1].mxu0 }
 0x13e   :  { %v547_v38 = vadd.f32 %v546_v37, %v545_v35  ;;  %v548_v39 = vpop.f32.mrb[2].mxu0 }
 0x13f   :  { %v549_v40 = vpop.f32.mrb[3].mxu0 }
 0x140   :  { %v254_v41 = vadd.f32 %v547_v38, %v494_v36 }
 0x142   :  { %v259_v42 = vmax.f32 %v254_v41, 0.0 }
 0x144   :  { %v260_v43 = vpack.c.bf16 %v259_v42, %v259_v42 }
 0x146   :  { %586 = vmatmul.mubr.bf16.vlgmr.msra.gmra.mrb[0].mxu1 %v260_v43 }
 0x219   :  { %v366_v47 = vpop.f32.mrb[0].mxu1 }
 0x21a   :  { %v367_v48 = vadd.f32 %v511_v46, %v366_v47  ;;  %v587_v49 = vpop.f32.mrb[1].mxu1 }
 0x21b   :  { %v369_v50 = vpop.f32.mrb[2].mxu1 }
 0x21c   :  { %v372_v51 = vmax.f32 %v367_v48, 0.0  ;;  %v588_v52 = vpop.f32.mrb[3].mxu1 }
 0x21e   :  { %v373_v53 = vpack.c.bf16 %v372_v51, %v372_v51 }
 0x220   :  { %606 = vmatmul.mubr.bf16.vlgmr.msra.gmra.mrb[4].mxu0 %v373_v53 }
 0x2f3   :  { %v479_v55 = vpop.f32.mrb[4].mxu0 }
 0x2f4   :  { %v480_v56 = vadd.f32 %v520_v54, %v479_v55  ;;  %v607_v57 = vpop.f32.mrb[5].mxu0 }
 0x2f5   :  { %v482_v58 = vpop.f32.mrb[6].mxu0 }
 0x2f6   :  { %v485_v59 = vpack.c.bf16 %v480_v56, %v480_v56  ;;  %v608_v60 = vpop.f32.mrb[7].mxu0 }
 0x2f8   :  { %486 = vst [vmem:[%s885_s7] sm:$0xf] %v485_v59 }
 0x2f9   :  { %491 = vsyncpa [#allocation3], 1 }
 0x2fa   :  { %492 = vsyncpa [#allocation5], 1 }
 0x2fb   :  { %493 = vsyncpa [#allocation8], 1 }

</bundles_post_ra>
